<compile_context>
chip_gen: v6e
topology: v6e:2x2x1
jax: 0.10.0
libtpu: 0.0.40
codegen_flags: <defaults>
</compile_context>

<pallas_src>
import functools

import jax
import jax.numpy as jnp
from jax import lax
from jax.experimental import pallas as pl
from jax.experimental.pallas import tpu as pltpu

INF = 1e9          # matches the torch module's finite "infinity"
PAD = 0
NEG = -1e30        # in-kernel "minus infinity" (finite -> no NaN arithmetic)


# -----------------------------------------------------------------------------
# Pallas kernel: streamed projection + online log_softmax + per-row top-(2*beam)
# -----------------------------------------------------------------------------
def beam_step_kernel(h_ref, w_ref, b_ref, alive_ref,          # inputs
                     lp_ref, id_ref,                           # outputs
                     m_ref, l_ref, cv_ref, ci_ref,             # running state
                     wv_ref, wi_ref,                           # merge workspace
                     *, k2, tv, cw):
    v = pl.program_id(0)
    bb = h_ref.shape[0]

    @pl.when(v == 0)
    def _init():
        m_ref[...] = jnp.full_like(m_ref, NEG)
        l_ref[...] = jnp.zeros_like(l_ref)
        cv_ref[...] = jnp.full_like(cv_ref, NEG)
        ci_ref[...] = jnp.full_like(ci_ref, -1)

    # MXU: (BB, H) bf16 @ (H, TV) bf16 -> f32, M = batch*beam
    logits = jnp.dot(h_ref[...], w_ref[...],
                     preferred_element_type=jnp.float32) + b_ref[...]

    # ---- online softmax statistics (running max / sum-exp per row) ----
    tile_max = jnp.max(logits, axis=-1, keepdims=True)          # (BB, 1)
    m_new = jnp.maximum(m_ref[...], tile_max)
    l_ref[...] = (l_ref[...] * jnp.exp(m_ref[...] - m_new)
                  + jnp.sum(jnp.exp(logits - m_new), axis=-1, keepdims=True))
    m_ref[...] = m_new

    # ---- merge this tile's raw logits into the running per-row top-k2 ----
    # (per-row constants -- LSE and beam score -- don't change per-row order,
    #  so raw logits are kept and normalization happens once at finalize)
    wv_ref[:, :cw] = cv_ref[...]
    wi_ref[:, :cw] = ci_ref[...]
    wv_ref[:, cw:cw + tv] = logits
    wi_ref[:, cw:cw + tv] = (v * tv
                             + lax.broadcasted_iota(jnp.int32, (bb, tv), 1))

    vals = wv_ref[...]                                          # (BB, cw+tv)
    ids = wi_ref[...]
    lane = lax.broadcasted_iota(jnp.int32, (bb, cw), 1)
    new_v = jnp.full((bb, cw), NEG, jnp.float32)
    new_i = jnp.full((bb, cw), -1, jnp.int32)
    big_i = jnp.int32(2 ** 31 - 1)
    for k in range(k2):                       # k2 = 2*beam: small, static unroll
        rowmax = jnp.max(vals, axis=-1, keepdims=True)                 # (BB, 1)
        sel = jnp.min(jnp.where(vals == rowmax, ids, big_i),
                      axis=-1, keepdims=True)                          # (BB, 1)
        new_v = jnp.where(lane == k, rowmax, new_v)
        new_i = jnp.where(lane == k, sel, new_i)
        vals = jnp.where(ids == sel, NEG, vals)
    cv_ref[...] = new_v
    ci_ref[...] = new_i

    # ---- finalize: normalize by full-vocab LSE and add previous beam score ----
    @pl.when(v == pl.num_programs(0) - 1)
    def _finalize():
        lse = m_ref[...] + jnp.log(l_ref[...])                  # (BB, 1)
        lp_ref[...] = jnp.where(ci_ref[...] >= 0,
                                cv_ref[...] - lse + alive_ref[...],
                                NEG)
        id_ref[...] = ci_ref[...]


def beam_step_pallas(hidden, alive_log_probs, w_out, b_out, beam, vocab):
    """hidden: [BB, H] (BB = batch*beam); alive_log_probs: [BB, 1].

    Returns per-row (per-beam) top-(2*beam):
      log_probs [BB, 2*beam] (log_softmax + alive), token ids [BB, 2*beam]."""
    BB, H = hidden.shape
    k2 = 2 * beam
    assert vocab >= k2, "vocab must be >= 2*beam for top-k selection"
    CW = 128                          # lane-dense candidate / output width
    assert k2 <= CW

    # vocab tile: sized so 2x(H, TV) bf16 buffers stay well inside VMEM on
    # every generation (v7x = 64 MiB).  Full vocab if it is small.
    TV = vocab
    if vocab > 2048:
        for t in (2048, 1024, 512, 256, 128):
            if vocab % t == 0:
                TV = t
                break
    assert vocab % TV == 0
    num_tiles = vocab // TV

    if w_out.dtype != jnp.bfloat16:
        w_out = w_out.astype(jnp.bfloat16)

    lp, ids = pl.pallas_call(
        functools.partial(beam_step_kernel, k2=k2, tv=TV, cw=CW),
        out_shape=(jax.ShapeDtypeStruct((BB, CW), jnp.float32),
                   jax.ShapeDtypeStruct((BB, CW), jnp.int32)),
        grid_spec=pltpu.PrefetchScalarGridSpec(
            num_scalar_prefetch=0,
            grid=(num_tiles,),
            in_specs=[
                pl.BlockSpec((BB, H), lambda v: (0, 0)),    # hidden: resident
                pl.BlockSpec((H, TV), lambda v: (0, v)),    # W_out: streamed
                pl.BlockSpec((1, TV), lambda v: (0, v)),    # bias:  streamed
                pl.BlockSpec((BB, 1), lambda v: (0, 0)),    # alive: resident
            ],
            out_specs=[
                pl.BlockSpec((BB, CW), lambda v: (0, 0)),
                pl.BlockSpec((BB, CW), lambda v: (0, 0)),
            ],
            scratch_shapes=[
                pltpu.VMEM((BB, 1), jnp.float32),           # running max
                pltpu.VMEM((BB, 1), jnp.float32),           # running sum-exp
                pltpu.VMEM((BB, CW), jnp.float32),          # candidate logits
                pltpu.VMEM((BB, CW), jnp.int32),            # candidate token ids
                pltpu.VMEM((BB, CW + TV), jnp.float32),     # merge workspace
                pltpu.VMEM((BB, CW + TV), jnp.int32),
            ],
        ),
        compiler_params=pltpu.CompilerParams(
            dimension_semantics=("arbitrary",),             # vocab = reduction axis
            vmem_limit_bytes=48 * 1024 * 1024,
        ),
    )(hidden.astype(jnp.bfloat16), w_out, b_out, alive_log_probs)
    return lp[:, :k2], ids[:, :k2]


# -----------------------------------------------------------------------------
# Synthetic encoder / decoder (deterministic params, plain-JAX glue)
# TODO(synk): real Transformer encoder/decoder stacks are replaced by a
#             deterministic embed + projection stand-in; only the output
#             projection + softmax + beam top-k hot path runs in Pallas.
# -----------------------------------------------------------------------------
def init_params(key, vocab, hidden):
    k1, k2, k3, k4, k5, k6 = jax.random.split(key, 6)
    s = 0.1
    return dict(
        E_src=s * jax.random.normal(k1, (vocab, hidden), jnp.float32),
        E_tgt=s * jax.random.normal(k2, (vocab, hidden), jnp.float32),
        W_enc=s * jax.random.normal(k3, (hidden, hidden), jnp.float32),
        W_ctx=s * jax.random.normal(k4, (hidden, hidden), jnp.float32),
        # W_out stored in bf16: halves the dominant HBM traffic and puts the
        # projection on the native bf16 MXU path.
        W_out=(s * jax.random.normal(k5, (hidden, vocab), jnp.float32)
               ).astype(jnp.bfloat16),
        b_out=s * jax.random.normal(k6, (1, vocab), jnp.float32),
    )


def encoder_apply(params, src):
    emb = params['E_src'][src]                         # [BB, S, H]
    key_padding_mask = (src == PAD)                    # True where padded
    enc = jnp.tanh(emb @ params['W_enc'])              # [BB, S, H]
    return enc, key_padding_mask


# -----------------------------------------------------------------------------
# Beam-search bookkeeping helpers (fixed shapes, jit/while_loop friendly)
# -----------------------------------------------------------------------------
def compute_topk_scores_and_seq(sequences, scores, scores_to_gather, flags,
                                beam_size, batch_pos):
    _, topk_indexes = lax.top_k(scores, beam_size)
    topk_seq = sequences[batch_pos, topk_indexes]
    topk_gathered = scores_to_gather[batch_pos, topk_indexes]
    topk_flags = flags[batch_pos, topk_indexes]
    return topk_seq, topk_gathered, topk_flags


# -----------------------------------------------------------------------------
# BeamSearchGenerator.forward
# -----------------------------------------------------------------------------
@functools.partial(jax.jit,
                   static_argnames=('beam', 'vocab', 'bos', 'eos', 'max_len'))
def beam_search_generate(params, src_input, *, beam, vocab, bos, eos, max_len):
    batch = src_input.shape[0]
    BB = batch * beam
    multiplier = 2
    k2 = beam * multiplier
    ML = max_len

    # tile_by_beam + encoder (loop-invariant, hoisted out of the decode loop)
    src = jnp.repeat(src_input, beam, axis=0)                     # [BB, S]
    enc_out, key_padding_mask = encoder_apply(params, src)
    valid = (~key_padding_mask).astype(jnp.float32)[:, :, None]
    ctx = (enc_out * valid).sum(axis=1) / jnp.maximum(valid.sum(axis=1), 1.0)
    ctx_proj = ctx @ params['W_ctx']                              # [BB, H]

    # fixed-shape state buffers ([batch, beam, max_len])
    alive_seq = jnp.zeros((batch, beam, ML), jnp.int32).at[:, :, 0].set(bos)
    alive_lp = jnp.tile(jnp.array([[0.0] + [-jnp.inf] * (beam - 1)],
                                  jnp.float32), (batch, 1))
    fin_seq = jnp.zeros((batch, beam, ML), jnp.int32)
    fin_scores = jnp.full((batch, beam), -INF, jnp.float32)
    fin_flags = jnp.zeros((batch, beam), bool)
    batch_fin = jnp.zeros((batch,), bool)

    beam_arange = jnp.arange(beam, dtype=jnp.int32)
    batch_pos = jnp.arange(batch, dtype=jnp.int32)[:, None]
    col_iota = jnp.arange(ML, dtype=jnp.int32)[None, None, :]
    tb0 = jnp.tile(beam_arange, (batch, multiplier))              # t==0 beam idx

    def cond_fn(state):
        t = state[0]
        bfin = state[6]
        return jnp.logical_and(t < max_len - 1, jnp.logical_not(jnp.all(bfin)))

    def body_fn(state):
        t, alive_seq, alive_lp, fin_seq, fin_scores, fin_flags, batch_fin = state

        # synthetic decoder hidden state for the last generated token
        last_tok = lax.dynamic_slice_in_dim(alive_seq, t, 1, axis=2).reshape(BB)
        hid = jnp.tanh(params['E_tgt'][last_tok] + ctx_proj
                       + 0.01 * (t + 1).astype(jnp.float32))      # [BB, H]

        # ---- fused Pallas hot path: projection + log_softmax + per-row topk ----
        cand_lp, cand_ids = beam_step_pallas(
            hid, alive_lp.reshape(BB, 1), params['W_out'], params['b_out'],
            beam, vocab)                                           # [BB, k2] each

        # tiny cross-beam merge (beam*k2 candidates per batch)
        cand_lp_b = cand_lp.reshape(batch, beam, k2)
        cand_flat = (beam_arange[None, :, None] * vocab
                     + cand_ids.reshape(batch, beam, k2))
        topk_lp, pos = lax.top_k(cand_lp_b.reshape(batch, beam * k2), k2)
        topk_flat = jnp.take_along_axis(cand_flat.reshape(batch, beam * k2),
                                        pos, axis=1)               # [B, 2*beam]

        length_penalty = (t + 1).astype(jnp.float32)
        topk_scores = topk_lp / length_penalty
        topk_log_probs = topk_lp          # == topk_scores * length_penalty

        topk_beam_index = jnp.where(t == 0, tb0, topk_flat // vocab)
        topk_ids = topk_flat % vocab

        topk_seq = alive_seq[batch_pos, topk_beam_index]           # [B, 2b, ML]
        topk_seq = jnp.where(col_iota == t + 1, topk_ids[:, :, None], topk_seq)
        topk_finished = topk_ids == eos

        curr_scores = topk_scores + topk_finished.astype(jnp.float32) * -INF
        alive_seq, alive_lp, _ = compute_topk_scores_and_seq(
            topk_seq, curr_scores, topk_log_probs, topk_finished, beam,
            batch_pos)

        fin_cand_scores = topk_scores + \
            (1.0 - topk_finished.astype(jnp.float32)) * -INF
        fin_cand_scores = fin_cand_scores + \
            batch_fin[:, None].astype(jnp.float32) * -INF
        fin_seq_cat = jnp.concatenate([fin_seq, topk_seq], axis=1)
        fin_scores_cat = jnp.concatenate([fin_scores, fin_cand_scores], axis=1)
        fin_flags_cat = jnp.concatenate([fin_flags, topk_finished], axis=1)
        fin_seq, fin_scores, fin_flags = compute_topk_scores_and_seq(
            fin_seq_cat, fin_scores_cat, fin_scores_cat, fin_flags_cat, beam,
            batch_pos)

        lower_bound_alive = alive_lp[:, 0] / length_penalty
        # jnp.where (not multiply-by-flag) avoids -inf * 0 = NaN
        low_fin = jnp.min(jnp.where(fin_flags, fin_scores, 0.0), axis=1)
        low_fin = low_fin + \
            (1.0 - jnp.all(fin_flags, axis=1).astype(jnp.float32)) * -INF
        batch_fin = jnp.logical_or(batch_fin, low_fin >= lower_bound_alive)

        return (t + 1, alive_seq, alive_lp, fin_seq, fin_scores, fin_flags,
                batch_fin)

    state = (jnp.int32(0), alive_seq, alive_lp, fin_seq, fin_scores,
             fin_flags, batch_fin)
    state = lax.while_loop(cond_fn, body_fn, state)
    fin_seq = state[3]
    return fin_seq[:, 0]                                           # [B, max_len]


if __name__ == "__main__":
    # small deterministic setup
    batch, beam, vocab, hidden, src_len = 2, 3, 32, 32, 8
    config = dict(tgt_bos_symbol=1, tgt_eos_symbol=2, decode_max_length=6,
                  beam_size=beam, num_vocabs=vocab)

    key = jax.random.PRNGKey(0)
    k_param, k_src = jax.random.split(key)
    params = init_params(k_param, vocab, hidden)

    src_input = jax.random.randint(k_src, (batch, src_len), 3, vocab,
                                   dtype=jnp.int32)
    src_input = src_input.at[:, -2:].set(PAD)   # exercise the padding mask

    out = beam_search_generate(
        params, src_input,
        beam=config['beam_size'], vocab=config['num_vocabs'],
        bos=config['tgt_bos_symbol'], eos=config['tgt_eos_symbol'],
        max_len=config['decode_max_length'])
    out = jax.block_until_ready(out)
    assert out.shape == (batch, config['decode_max_length'])
    print("KERNEL_OK")
</pallas_src>

<mosaic_0001>
module attributes {stable_mosaic.version = 11 : i64} {
  func.func @beam_step_kernel(%arg0: i32, %arg1: memref<6x32xbf16, #tpu.memory_space<vmem>>, %arg2: memref<32x32xbf16, #tpu.memory_space<vmem>>, %arg3: memref<1x32xf32, #tpu.memory_space<vmem>>, %arg4: memref<6x1xf32, #tpu.memory_space<vmem>>, %arg5: memref<6x128xf32, #tpu.memory_space<vmem>>, %arg6: memref<6x128xi32, #tpu.memory_space<vmem>>, %arg7: memref<6x1xf32, #tpu.memory_space<vmem>>, %arg8: memref<6x1xf32, #tpu.memory_space<vmem>>, %arg9: memref<6x128xf32, #tpu.memory_space<vmem>>, %arg10: memref<6x128xi32, #tpu.memory_space<vmem>>, %arg11: memref<6x160xf32, #tpu.memory_space<vmem>>, %arg12: memref<6x160xi32, #tpu.memory_space<vmem>>) attributes {dimension_semantics = [#tpu.dimension_semantics<arbitrary>], iteration_bounds = array<i64: 1>, scalar_prefetch = 0 : i64, scratch_operands = 6 : i64, tpu.core_type = #tpu.core_type<tc>, window_params = [{pipeline_mode = #tpu.pipeline_mode<synchronous>, transform_indices = @transform_0, window_bounds = array<i64: 6, 32>}, {transform_indices = @transform_1, window_bounds = array<i64: 32, 32>}, {transform_indices = @transform_2, window_bounds = array<i64: 1, 32>}, {pipeline_mode = #tpu.pipeline_mode<synchronous>, transform_indices = @transform_3, window_bounds = array<i64: 6, 1>}, {pipeline_mode = #tpu.pipeline_mode<synchronous>, transform_indices = @transform_4, window_bounds = array<i64: 6, 128>}, {pipeline_mode = #tpu.pipeline_mode<synchronous>, transform_indices = @transform_5, window_bounds = array<i64: 6, 128>}]} {
    %c0_i32 = arith.constant 0 : i32
    %0 = arith.cmpi eq, %arg0, %c0_i32 : i32
    %1 = arith.extui %0 : i1 to i32
    %c0_i32_0 = arith.constant 0 : i32
    %2 = arith.cmpi ne, %1, %c0_i32_0 : i32
    scf.if %2 {
      %cst_69 = arith.constant -1.000000e+30 : f32
      %174 = vector.broadcast %cst_69 : f32 to vector<6x1xf32>
      %c0_70 = arith.constant 0 : index
      %c0_71 = arith.constant 0 : index
      %175 = vector.load %arg7[%c0_70, %c0_71] : memref<6x1xf32, #tpu.memory_space<vmem>>, vector<6x1xf32>
      tpu.vector_store %arg7[%c0_70, %c0_71], %174 {strides = array<i32>} : memref<6x1xf32, #tpu.memory_space<vmem>>, vector<6x1xf32>,
      %cst_72 = arith.constant 0.000000e+00 : f32
      %176 = vector.broadcast %cst_72 : f32 to vector<6x1xf32>
      %c0_73 = arith.constant 0 : index
      %c0_74 = arith.constant 0 : index
      %177 = vector.load %arg8[%c0_73, %c0_74] : memref<6x1xf32, #tpu.memory_space<vmem>>, vector<6x1xf32>
      tpu.vector_store %arg8[%c0_73, %c0_74], %176 {strides = array<i32>} : memref<6x1xf32, #tpu.memory_space<vmem>>, vector<6x1xf32>,
      %cst_75 = arith.constant -1.000000e+30 : f32
      %178 = vector.broadcast %cst_75 : f32 to vector<6x128xf32>
      %c0_76 = arith.constant 0 : index
      %c0_77 = arith.constant 0 : index
      %179 = vector.load %arg9[%c0_76, %c0_77] : memref<6x128xf32, #tpu.memory_space<vmem>>, vector<6x128xf32>
      tpu.vector_store %arg9[%c0_76, %c0_77], %178 {strides = array<i32>} : memref<6x128xf32, #tpu.memory_space<vmem>>, vector<6x128xf32>,
      %c-1_i32_78 = arith.constant -1 : i32
      %180 = vector.broadcast %c-1_i32_78 : i32 to vector<6x128xi32>
      %c0_79 = arith.constant 0 : index
      %c0_80 = arith.constant 0 : index
      %181 = vector.load %arg10[%c0_79, %c0_80] : memref<6x128xi32, #tpu.memory_space<vmem>>, vector<6x128xi32>
      tpu.vector_store %arg10[%c0_79, %c0_80], %180 {strides = array<i32>} : memref<6x128xi32, #tpu.memory_space<vmem>>, vector<6x128xi32>,
    } else {
    }
    %c0 = arith.constant 0 : index
    %c0_1 = arith.constant 0 : index
    %3 = vector.load %arg1[%c0, %c0_1] : memref<6x32xbf16, #tpu.memory_space<vmem>>, vector<6x32xbf16>
    %c0_2 = arith.constant 0 : index
    %c0_3 = arith.constant 0 : index
    %4 = vector.load %arg2[%c0_2, %c0_3] : memref<32x32xbf16, #tpu.memory_space<vmem>>, vector<32x32xbf16>
    %cst = arith.constant dense<0.000000e+00> : vector<6x32xf32>
    %5 = tpu.matmul %3, %4, %cst {dimension_numbers = #tpu.dot_dimension_numbers<[1], [0], [0], [1], [0, 0, 1, 1], [], []>} : vector<6x32xbf16>, vector<32x32xbf16>, vector<6x32xf32> -> vector<6x32xf32>
    %c0_4 = arith.constant 0 : index
    %c0_5 = arith.constant 0 : index
    %6 = vector.load %arg3[%c0_4, %c0_5] : memref<1x32xf32, #tpu.memory_space<vmem>>, vector<1x32xf32>
    %7 = vector.broadcast %6 : vector<1x32xf32> to vector<6x32xf32>
    %8 = arith.addf %5, %7 : vector<6x32xf32>
    %cst_6 = arith.constant dense<0xFF800000> : vector<6xf32>
    %9 = vector.multi_reduction <maximumf>, %8, %cst_6 [1] : vector<6x32xf32> to vector<6xf32>
    %10 = vector.shape_cast %9 : vector<6xf32> to vector<6x1xf32>
    %c0_7 = arith.constant 0 : index
    %c0_8 = arith.constant 0 : index
    %11 = vector.load %arg7[%c0_7, %c0_8] : memref<6x1xf32, #tpu.memory_space<vmem>>, vector<6x1xf32>
    %12 = arith.maximumf %11, %10 : vector<6x1xf32>
    %c0_9 = arith.constant 0 : index
    %c0_10 = arith.constant 0 : index
    %13 = vector.load %arg8[%c0_9, %c0_10] : memref<6x1xf32, #tpu.memory_space<vmem>>, vector<6x1xf32>
    %c0_11 = arith.constant 0 : index
    %c0_12 = arith.constant 0 : index
    %14 = vector.load %arg7[%c0_11, %c0_12] : memref<6x1xf32, #tpu.memory_space<vmem>>, vector<6x1xf32>
    %15 = arith.subf %14, %12 : vector<6x1xf32>
    %16 = math.exp %15 : vector<6x1xf32>
    %17 = arith.mulf %13, %16 : vector<6x1xf32>
    %18 = vector.broadcast %12 : vector<6x1xf32> to vector<6x32xf32>
    %19 = arith.subf %8, %18 : vector<6x32xf32>
    %20 = math.exp %19 : vector<6x32xf32>
    %cst_13 = arith.constant dense<0.000000e+00> : vector<6xf32>
    %21 = vector.multi_reduction <add>, %20, %cst_13 [1] : vector<6x32xf32> to vector<6xf32>
    %22 = vector.shape_cast %21 : vector<6xf32> to vector<6x1xf32>
    %23 = arith.addf %17, %22 : vector<6x1xf32>
    %c0_14 = arith.constant 0 : index
    %c0_15 = arith.constant 0 : index
    %24 = vector.load %arg8[%c0_14, %c0_15] : memref<6x1xf32, #tpu.memory_space<vmem>>, vector<6x1xf32>
    tpu.vector_store %arg8[%c0_14, %c0_15], %23 {strides = array<i32>} : memref<6x1xf32, #tpu.memory_space<vmem>>, vector<6x1xf32>,
    %c0_16 = arith.constant 0 : index
    %c0_17 = arith.constant 0 : index
    %25 = vector.load %arg7[%c0_16, %c0_17] : memref<6x1xf32, #tpu.memory_space<vmem>>, vector<6x1xf32>
    tpu.vector_store %arg7[%c0_16, %c0_17], %12 {strides = array<i32>} : memref<6x1xf32, #tpu.memory_space<vmem>>, vector<6x1xf32>,
    %c0_18 = arith.constant 0 : index
    %c0_19 = arith.constant 0 : index
    %26 = vector.load %arg9[%c0_18, %c0_19] : memref<6x128xf32, #tpu.memory_space<vmem>>, vector<6x128xf32>
    %c0_20 = arith.constant 0 : index
    %c0_21 = arith.constant 0 : index
    %27 = vector.load %arg11[%c0_20, %c0_21] : memref<6x160xf32, #tpu.memory_space<vmem>>, vector<6x128xf32>
    tpu.vector_store %arg11[%c0_20, %c0_21], %26 {strides = array<i32>} : memref<6x160xf32, #tpu.memory_space<vmem>>, vector<6x128xf32>,
    %c0_22 = arith.constant 0 : index
    %c0_23 = arith.constant 0 : index
    %28 = vector.load %arg10[%c0_22, %c0_23] : memref<6x128xi32, #tpu.memory_space<vmem>>, vector<6x128xi32>
    %c0_24 = arith.constant 0 : index
    %c0_25 = arith.constant 0 : index
    %29 = vector.load %arg12[%c0_24, %c0_25] : memref<6x160xi32, #tpu.memory_space<vmem>>, vector<6x128xi32>
    tpu.vector_store %arg12[%c0_24, %c0_25], %28 {strides = array<i32>} : memref<6x160xi32, #tpu.memory_space<vmem>>, vector<6x128xi32>,
    %c0_26 = arith.constant 0 : index
    %c128 = arith.constant 128 : index
    %30 = vector.load %arg11[%c0_26, %c128] : memref<6x160xf32, #tpu.memory_space<vmem>>, vector<6x32xf32>
    tpu.vector_store %arg11[%c0_26, %c128], %8 {strides = array<i32>} : memref<6x160xf32, #tpu.memory_space<vmem>>, vector<6x32xf32>,
    %c32_i32 = arith.constant 32 : i32
    %31 = arith.muli %arg0, %c32_i32 : i32
    %32 = tpu.iota {dimensions = array<i32: 1>} : vector<6x32xi32>
    %33 = vector.broadcast %31 : i32 to vector<6x32xi32>
    %34 = arith.addi %33, %32 : vector<6x32xi32>
    %c0_27 = arith.constant 0 : index
    %c128_28 = arith.constant 128 : index
    %35 = vector.load %arg12[%c0_27, %c128_28] : memref<6x160xi32, #tpu.memory_space<vmem>>, vector<6x32xi32>
    tpu.vector_store %arg12[%c0_27, %c128_28], %34 {strides = array<i32>} : memref<6x160xi32, #tpu.memory_space<vmem>>, vector<6x32xi32>,
    %c0_29 = arith.constant 0 : index
    %c0_30 = arith.constant 0 : index
    %36 = vector.load %arg11[%c0_29, %c0_30] : memref<6x160xf32, #tpu.memory_space<vmem>>, vector<6x160xf32>
    %c0_31 = arith.constant 0 : index
    %c0_32 = arith.constant 0 : index
    %37 = vector.load %arg12[%c0_31, %c0_32] : memref<6x160xi32, #tpu.memory_space<vmem>>, vector<6x160xi32>
    %38 = tpu.iota {dimensions = array<i32: 1>} : vector<6x128xi32>
    %cst_33 = arith.constant -1.000000e+30 : f32
    %39 = vector.broadcast %cst_33 : f32 to vector<6x128xf32>
    %c-1_i32 = arith.constant -1 : i32
    %40 = vector.broadcast %c-1_i32 : i32 to vector<6x128xi32>
    %cst_34 = arith.constant dense<0xFF800000> : vector<6xf32>
    %41 = vector.multi_reduction <maximumf>, %36, %cst_34 [1] : vector<6x160xf32> to vector<6xf32>
    %42 = vector.shape_cast %41 : vector<6xf32> to vector<6x1xf32>
    %43 = vector.broadcast %42 : vector<6x1xf32> to vector<6x160xf32>
    %44 = arith.cmpf oeq, %36, %43 : vector<6x160xf32>
    %c2147483647_i32 = arith.constant 2147483647 : i32
    %45 = vector.broadcast %c2147483647_i32 : i32 to vector<6x160xi32>
    %46 = arith.select %44, %37, %45 : vector<6x160xi1>, vector<6x160xi32>
    %cst_35 = arith.constant dense<2147483647> : vector<6xi32>
    %47 = vector.multi_reduction <minsi>, %46, %cst_35 [1] : vector<6x160xi32> to vector<6xi32>
    %48 = vector.shape_cast %47 : vector<6xi32> to vector<6x1xi32>
    %c0_i32_36 = arith.constant 0 : i32
    %49 = vector.broadcast %c0_i32_36 : i32 to vector<6x128xi32>
    %50 = arith.cmpi eq, %38, %49 : vector<6x128xi32>
    %51 = vector.shape_cast %42 : vector<6x1xf32> to vector<6x1xf32>
    %52 = vector.broadcast %51 : vector<6x1xf32> to vector<6x128xf32>
    %53 = arith.select %50, %52, %39 : vector<6x128xi1>, vector<6x128xf32>
    %c0_i32_37 = arith.constant 0 : i32
    %54 = vector.broadcast %c0_i32_37 : i32 to vector<6x128xi32>
    %55 = arith.cmpi eq, %38, %54 : vector<6x128xi32>
    %56 = vector.shape_cast %48 : vector<6x1xi32> to vector<6x1xi32>
    %57 = vector.broadcast %56 : vector<6x1xi32> to vector<6x128xi32>
    %58 = arith.select %55, %57, %40 : vector<6x128xi1>, vector<6x128xi32>
    %59 = vector.broadcast %48 : vector<6x1xi32> to vector<6x160xi32>
    %60 = arith.cmpi eq, %37, %59 : vector<6x160xi32>
    %cst_38 = arith.constant -1.000000e+30 : f32
    %61 = vector.broadcast %cst_38 : f32 to vector<6x160xf32>
    %62 = arith.select %60, %61, %36 : vector<6x160xi1>, vector<6x160xf32>
    %cst_39 = arith.constant dense<0xFF800000> : vector<6xf32>
    %63 = vector.multi_reduction <maximumf>, %62, %cst_39 [1] : vector<6x160xf32> to vector<6xf32>
    %64 = vector.shape_cast %63 : vector<6xf32> to vector<6x1xf32>
    %65 = vector.broadcast %64 : vector<6x1xf32> to vector<6x160xf32>
    %66 = arith.cmpf oeq, %62, %65 : vector<6x160xf32>
    %c2147483647_i32_40 = arith.constant 2147483647 : i32
    %67 = vector.broadcast %c2147483647_i32_40 : i32 to vector<6x160xi32>
    %68 = arith.select %66, %37, %67 : vector<6x160xi1>, vector<6x160xi32>
    %cst_41 = arith.constant dense<2147483647> : vector<6xi32>
    %69 = vector.multi_reduction <minsi>, %68, %cst_41 [1] : vector<6x160xi32> to vector<6xi32>
    %70 = vector.shape_cast %69 : vector<6xi32> to vector<6x1xi32>
    %c1_i32 = arith.constant 1 : i32
    %71 = vector.broadcast %c1_i32 : i32 to vector<6x128xi32>
    %72 = arith.cmpi eq, %38, %71 : vector<6x128xi32>
    %73 = vector.shape_cast %64 : vector<6x1xf32> to vector<6x1xf32>
    %74 = vector.broadcast %73 : vector<6x1xf32> to vector<6x128xf32>
    %75 = arith.select %72, %74, %53 : vector<6x128xi1>, vector<6x128xf32>
    %c1_i32_42 = arith.constant 1 : i32
    %76 = vector.broadcast %c1_i32_42 : i32 to vector<6x128xi32>
    %77 = arith.cmpi eq, %38, %76 : vector<6x128xi32>
    %78 = vector.shape_cast %70 : vector<6x1xi32> to vector<6x1xi32>
    %79 = vector.broadcast %78 : vector<6x1xi32> to vector<6x128xi32>
    %80 = arith.select %77, %79, %58 : vector<6x128xi1>, vector<6x128xi32>
    %81 = vector.broadcast %70 : vector<6x1xi32> to vector<6x160xi32>
    %82 = arith.cmpi eq, %37, %81 : vector<6x160xi32>
    %cst_43 = arith.constant -1.000000e+30 : f32
    %83 = vector.broadcast %cst_43 : f32 to vector<6x160xf32>
    %84 = arith.select %82, %83, %62 : vector<6x160xi1>, vector<6x160xf32>
    %cst_44 = arith.constant dense<0xFF800000> : vector<6xf32>
    %85 = vector.multi_reduction <maximumf>, %84, %cst_44 [1] : vector<6x160xf32> to vector<6xf32>
    %86 = vector.shape_cast %85 : vector<6xf32> to vector<6x1xf32>
    %87 = vector.broadcast %86 : vector<6x1xf32> to vector<6x160xf32>
    %88 = arith.cmpf oeq, %84, %87 : vector<6x160xf32>
    %c2147483647_i32_45 = arith.constant 2147483647 : i32
    %89 = vector.broadcast %c2147483647_i32_45 : i32 to vector<6x160xi32>
    %90 = arith.select %88, %37, %89 : vector<6x160xi1>, vector<6x160xi32>
    %cst_46 = arith.constant dense<2147483647> : vector<6xi32>
    %91 = vector.multi_reduction <minsi>, %90, %cst_46 [1] : vector<6x160xi32> to vector<6xi32>
    %92 = vector.shape_cast %91 : vector<6xi32> to vector<6x1xi32>
    %c2_i32 = arith.constant 2 : i32
    %93 = vector.broadcast %c2_i32 : i32 to vector<6x128xi32>
    %94 = arith.cmpi eq, %38, %93 : vector<6x128xi32>
    %95 = vector.shape_cast %86 : vector<6x1xf32> to vector<6x1xf32>
    %96 = vector.broadcast %95 : vector<6x1xf32> to vector<6x128xf32>
    %97 = arith.select %94, %96, %75 : vector<6x128xi1>, vector<6x128xf32>
    %c2_i32_47 = arith.constant 2 : i32
    %98 = vector.broadcast %c2_i32_47 : i32 to vector<6x128xi32>
    %99 = arith.cmpi eq, %38, %98 : vector<6x128xi32>
    %100 = vector.shape_cast %92 : vector<6x1xi32> to vector<6x1xi32>
    %101 = vector.broadcast %100 : vector<6x1xi32> to vector<6x128xi32>
    %102 = arith.select %99, %101, %80 : vector<6x128xi1>, vector<6x128xi32>
    %103 = vector.broadcast %92 : vector<6x1xi32> to vector<6x160xi32>
    %104 = arith.cmpi eq, %37, %103 : vector<6x160xi32>
    %cst_48 = arith.constant -1.000000e+30 : f32
    %105 = vector.broadcast %cst_48 : f32 to vector<6x160xf32>
    %106 = arith.select %104, %105, %84 : vector<6x160xi1>, vector<6x160xf32>
    %cst_49 = arith.constant dense<0xFF800000> : vector<6xf32>
    %107 = vector.multi_reduction <maximumf>, %106, %cst_49 [1] : vector<6x160xf32> to vector<6xf32>
    %108 = vector.shape_cast %107 : vector<6xf32> to vector<6x1xf32>
    %109 = vector.broadcast %108 : vector<6x1xf32> to vector<6x160xf32>
    %110 = arith.cmpf oeq, %106, %109 : vector<6x160xf32>
    %c2147483647_i32_50 = arith.constant 2147483647 : i32
    %111 = vector.broadcast %c2147483647_i32_50 : i32 to vector<6x160xi32>
    %112 = arith.select %110, %37, %111 : vector<6x160xi1>, vector<6x160xi32>
    %cst_51 = arith.constant dense<2147483647> : vector<6xi32>
    %113 = vector.multi_reduction <minsi>, %112, %cst_51 [1] : vector<6x160xi32> to vector<6xi32>
    %114 = vector.shape_cast %113 : vector<6xi32> to vector<6x1xi32>
    %c3_i32 = arith.constant 3 : i32
    %115 = vector.broadcast %c3_i32 : i32 to vector<6x128xi32>
    %116 = arith.cmpi eq, %38, %115 : vector<6x128xi32>
    %117 = vector.shape_cast %108 : vector<6x1xf32> to vector<6x1xf32>
    %118 = vector.broadcast %117 : vector<6x1xf32> to vector<6x128xf32>
    %119 = arith.select %116, %118, %97 : vector<6x128xi1>, vector<6x128xf32>
    %c3_i32_52 = arith.constant 3 : i32
    %120 = vector.broadcast %c3_i32_52 : i32 to vector<6x128xi32>
    %121 = arith.cmpi eq, %38, %120 : vector<6x128xi32>
    %122 = vector.shape_cast %114 : vector<6x1xi32> to vector<6x1xi32>
    %123 = vector.broadcast %122 : vector<6x1xi32> to vector<6x128xi32>
    %124 = arith.select %121, %123, %102 : vector<6x128xi1>, vector<6x128xi32>
    %125 = vector.broadcast %114 : vector<6x1xi32> to vector<6x160xi32>
    %126 = arith.cmpi eq, %37, %125 : vector<6x160xi32>
    %cst_53 = arith.constant -1.000000e+30 : f32
    %127 = vector.broadcast %cst_53 : f32 to vector<6x160xf32>
    %128 = arith.select %126, %127, %106 : vector<6x160xi1>, vector<6x160xf32>
    %cst_54 = arith.constant dense<0xFF800000> : vector<6xf32>
    %129 = vector.multi_reduction <maximumf>, %128, %cst_54 [1] : vector<6x160xf32> to vector<6xf32>
    %130 = vector.shape_cast %129 : vector<6xf32> to vector<6x1xf32>
    %131 = vector.broadcast %130 : vector<6x1xf32> to vector<6x160xf32>
    %132 = arith.cmpf oeq, %128, %131 : vector<6x160xf32>
    %c2147483647_i32_55 = arith.constant 2147483647 : i32
    %133 = vector.broadcast %c2147483647_i32_55 : i32 to vector<6x160xi32>
    %134 = arith.select %132, %37, %133 : vector<6x160xi1>, vector<6x160xi32>
    %cst_56 = arith.constant dense<2147483647> : vector<6xi32>
    %135 = vector.multi_reduction <minsi>, %134, %cst_56 [1] : vector<6x160xi32> to vector<6xi32>
    %136 = vector.shape_cast %135 : vector<6xi32> to vector<6x1xi32>
    %c4_i32 = arith.constant 4 : i32
    %137 = vector.broadcast %c4_i32 : i32 to vector<6x128xi32>
    %138 = arith.cmpi eq, %38, %137 : vector<6x128xi32>
    %139 = vector.shape_cast %130 : vector<6x1xf32> to vector<6x1xf32>
    %140 = vector.broadcast %139 : vector<6x1xf32> to vector<6x128xf32>
    %141 = arith.select %138, %140, %119 : vector<6x128xi1>, vector<6x128xf32>
    %c4_i32_57 = arith.constant 4 : i32
    %142 = vector.broadcast %c4_i32_57 : i32 to vector<6x128xi32>
    %143 = arith.cmpi eq, %38, %142 : vector<6x128xi32>
    %144 = vector.shape_cast %136 : vector<6x1xi32> to vector<6x1xi32>
    %145 = vector.broadcast %144 : vector<6x1xi32> to vector<6x128xi32>
    %146 = arith.select %143, %145, %124 : vector<6x128xi1>, vector<6x128xi32>
    %147 = vector.broadcast %136 : vector<6x1xi32> to vector<6x160xi32>
    %148 = arith.cmpi eq, %37, %147 : vector<6x160xi32>
    %cst_58 = arith.constant -1.000000e+30 : f32
    %149 = vector.broadcast %cst_58 : f32 to vector<6x160xf32>
    %150 = arith.select %148, %149, %128 : vector<6x160xi1>, vector<6x160xf32>
    %cst_59 = arith.constant dense<0xFF800000> : vector<6xf32>
    %151 = vector.multi_reduction <maximumf>, %150, %cst_59 [1] : vector<6x160xf32> to vector<6xf32>
    %152 = vector.shape_cast %151 : vector<6xf32> to vector<6x1xf32>
    %153 = vector.broadcast %152 : vector<6x1xf32> to vector<6x160xf32>
    %154 = arith.cmpf oeq, %150, %153 : vector<6x160xf32>
    %c2147483647_i32_60 = arith.constant 2147483647 : i32
    %155 = vector.broadcast %c2147483647_i32_60 : i32 to vector<6x160xi32>
    %156 = arith.select %154, %37, %155 : vector<6x160xi1>, vector<6x160xi32>
    %cst_61 = arith.constant dense<2147483647> : vector<6xi32>
    %157 = vector.multi_reduction <minsi>, %156, %cst_61 [1] : vector<6x160xi32> to vector<6xi32>
    %158 = vector.shape_cast %157 : vector<6xi32> to vector<6x1xi32>
    %c5_i32 = arith.constant 5 : i32
    %159 = vector.broadcast %c5_i32 : i32 to vector<6x128xi32>
    %160 = arith.cmpi eq, %38, %159 : vector<6x128xi32>
    %161 = vector.shape_cast %152 : vector<6x1xf32> to vector<6x1xf32>
    %162 = vector.broadcast %161 : vector<6x1xf32> to vector<6x128xf32>
    %163 = arith.select %160, %162, %141 : vector<6x128xi1>, vector<6x128xf32>
    %c5_i32_62 = arith.constant 5 : i32
    %164 = vector.broadcast %c5_i32_62 : i32 to vector<6x128xi32>
    %165 = arith.cmpi eq, %38, %164 : vector<6x128xi32>
    %166 = vector.shape_cast %158 : vector<6x1xi32> to vector<6x1xi32>
    %167 = vector.broadcast %166 : vector<6x1xi32> to vector<6x128xi32>
    %168 = arith.select %165, %167, %146 : vector<6x128xi1>, vector<6x128xi32>
    %c0_63 = arith.constant 0 : index
    %c0_64 = arith.constant 0 : index
    %169 = vector.load %arg9[%c0_63, %c0_64] : memref<6x128xf32, #tpu.memory_space<vmem>>, vector<6x128xf32>
    tpu.vector_store %arg9[%c0_63, %c0_64], %163 {strides = array<i32>} : memref<6x128xf32, #tpu.memory_space<vmem>>, vector<6x128xf32>,
    %c0_65 = arith.constant 0 : index
    %c0_66 = arith.constant 0 : index
    %170 = vector.load %arg10[%c0_65, %c0_66] : memref<6x128xi32, #tpu.memory_space<vmem>>, vector<6x128xi32>
    tpu.vector_store %arg10[%c0_65, %c0_66], %168 {strides = array<i32>} : memref<6x128xi32, #tpu.memory_space<vmem>>, vector<6x128xi32>,
    %c0_i32_67 = arith.constant 0 : i32
    %171 = arith.cmpi eq, %arg0, %c0_i32_67 : i32
    %172 = arith.extui %171 : i1 to i32
    %c0_i32_68 = arith.constant 0 : i32
    %173 = arith.cmpi ne, %172, %c0_i32_68 : i32
    scf.if %173 {
      %c0_69 = arith.constant 0 : index
      %c0_70 = arith.constant 0 : index
      %174 = vector.load %arg7[%c0_69, %c0_70] : memref<6x1xf32, #tpu.memory_space<vmem>>, vector<6x1xf32>
      %c0_71 = arith.constant 0 : index
      %c0_72 = arith.constant 0 : index
      %175 = vector.load %arg8[%c0_71, %c0_72] : memref<6x1xf32, #tpu.memory_space<vmem>>, vector<6x1xf32>
      %176 = math.log %175 : vector<6x1xf32>
      %177 = arith.addf %174, %176 : vector<6x1xf32>
      %c0_73 = arith.constant 0 : index
      %c0_74 = arith.constant 0 : index
      %178 = vector.load %arg10[%c0_73, %c0_74] : memref<6x128xi32, #tpu.memory_space<vmem>>, vector<6x128xi32>
      %c0_i32_75 = arith.constant 0 : i32
      %179 = vector.broadcast %c0_i32_75 : i32 to vector<6x128xi32>
      %180 = arith.cmpi sge, %178, %179 : vector<6x128xi32>
      %c0_76 = arith.constant 0 : index
      %c0_77 = arith.constant 0 : index
      %181 = vector.load %arg9[%c0_76, %c0_77] : memref<6x128xf32, #tpu.memory_space<vmem>>, vector<6x128xf32>
      %182 = vector.broadcast %177 : vector<6x1xf32> to vector<6x128xf32>
      %183 = arith.subf %181, %182 : vector<6x128xf32>
      %c0_78 = arith.constant 0 : index
      %c0_79 = arith.constant 0 : index
      %184 = vector.load %arg4[%c0_78, %c0_79] : memref<6x1xf32, #tpu.memory_space<vmem>>, vector<6x1xf32>
      %185 = vector.broadcast %184 : vector<6x1xf32> to vector<6x128xf32>
      %186 = arith.addf %183, %185 : vector<6x128xf32>
      %cst_80 = arith.constant -1.000000e+30 : f32
      %187 = vector.broadcast %cst_80 : f32 to vector<6x128xf32>
      %188 = arith.select %180, %186, %187 : vector<6x128xi1>, vector<6x128xf32>
      %c0_81 = arith.constant 0 : index
      %c0_82 = arith.constant 0 : index
      %189 = vector.load %arg5[%c0_81, %c0_82] : memref<6x128xf32, #tpu.memory_space<vmem>>, vector<6x128xf32>
      tpu.vector_store %arg5[%c0_81, %c0_82], %188 {strides = array<i32>} : memref<6x128xf32, #tpu.memory_space<vmem>>, vector<6x128xf32>,
      %c0_83 = arith.constant 0 : index
      %c0_84 = arith.constant 0 : index
      %190 = vector.load %arg10[%c0_83, %c0_84] : memref<6x128xi32, #tpu.memory_space<vmem>>, vector<6x128xi32>
      %c0_85 = arith.constant 0 : index
      %c0_86 = arith.constant 0 : index
      %191 = vector.load %arg6[%c0_85, %c0_86] : memref<6x128xi32, #tpu.memory_space<vmem>>, vector<6x128xi32>
      tpu.vector_store %arg6[%c0_85, %c0_86], %190 {strides = array<i32>} : memref<6x128xi32, #tpu.memory_space<vmem>>, vector<6x128xi32>,
    } else {
    }
    return
  }
  func.func @transform_0(%arg0: i32) -> (i32, i32) {
    %c0_i32 = arith.constant 0 : i32
    %c0_i32_0 = arith.constant 0 : i32
    %c0_i32_1 = arith.constant 0 : i32
    return %c0_i32, %c0_i32_0 : i32, i32
  }
  func.func @transform_1(%arg0: i32) -> (i32, i32) {
    %c0_i32 = arith.constant 0 : i32
    %c0_i32_0 = arith.constant 0 : i32
    return %c0_i32, %arg0 : i32, i32
  }
  func.func @transform_2(%arg0: i32) -> (i32, i32) {
    %c0_i32 = arith.constant 0 : i32
    %c0_i32_0 = arith.constant 0 : i32
    return %c0_i32, %arg0 : i32, i32
  }
  func.func @transform_3(%arg0: i32) -> (i32, i32) {
    %c0_i32 = arith.constant 0 : i32
    %c0_i32_0 = arith.constant 0 : i32
    %c0_i32_1 = arith.constant 0 : i32
    return %c0_i32, %c0_i32_0 : i32, i32
  }
  func.func @transform_4(%arg0: i32) -> (i32, i32) {
    %c0_i32 = arith.constant 0 : i32
    %c0_i32_0 = arith.constant 0 : i32
    %c0_i32_1 = arith.constant 0 : i32
    return %c0_i32, %c0_i32_0 : i32, i32
  }
  func.func @transform_5(%arg0: i32) -> (i32, i32) {
    %c0_i32 = arith.constant 0 : i32
    %c0_i32_0 = arith.constant 0 : i32
    %c0_i32_1 = arith.constant 0 : i32
    return %c0_i32, %c0_i32_0 : i32, i32
  }
}

</mosaic_0001>

<bundles_post_ra>
// kernel: body.7
= control target key start
LH: loop header
LB: loop body
LE: loop exit
PB: predicated region body
PF: predicated region fallthrough
CT: control target
= control target key end

     0   :  { %vm24_vm0 = vcmask 5120   ;;  %v407_v0 = vmov 0.0   ;;  %vm408_vm1 = vmmov 0   ;;  %vm53_vm2 = vcmask 261120   ;;  %s582_s1 = inlined_call_operand.vmem [shape: bf16[32,32], index: 1, kind: input, shape index: {}]   ;;  %s583_s0 = inlined_call_operand.vmem [shape: bf16[6,32], index: 0, kind: input, shape index: {}]   ;;  %s584_s2 = inlined_call_operand.vmem [shape: f32[1,32], index: 2, kind: input, shape index: {}]   ;;  %s585_s3 = inlined_call_operand.vmem [shape: f32[6,1], index: 3, kind: input, shape index: {}]   ;;  %s586_s5 = inlined_call_operand.vmem [shape: s32[6,128], index: 5, kind: output, shape index: {1}]   ;;  %s587_s4 = inlined_call_operand.vmem [shape: f32[6,128], index: 4, kind: output, shape index: {0}]  }
   0x1   :  { %26 = vst.msk [vmem:[#allocation3] sm:$0x3f] %vm24_vm0, %v407_v0  ;;  %384 = vmatprep.subr.bf16.mxu0 %v407_v0  ;;  %v399_v1 = vld [vmem:[%s582_s1 + $0x8] sm:$0xff]   ;;  %388 = vmatprep.mubr.msk.bf16.mxu0 %vm408_vm1, %v407_v0  ;;  %v400_v2 = vld [vmem:[%s582_s1] sm:$0xff]   ;;  %v409_v4 = vmov -1e+30   ;;  %v129_v6 = vlaneseq }
   0x2   :  { %385 = vmatpush3.bf16.msra.mxu0 %v399_v1  ;;  %v29_v3 = vld [vmem:[%s583_s0] sm:$0x7]  ;;  %27 = vst [vmem:[#allocation4] sm:$0x3f] %v409_v4  ;;  %25 = vst.msk [vmem:[#allocation2] sm:$0x3f] %vm24_vm0, %v409_v4 }
   0x3   :  { %386 = vmatprep.subr.bf16.mxu0 %v407_v0  ;;  %v410_v7 = vmov 4294967295   ;;  %v453_v8 = vand.u32 127, %v129_v6  ;;  %vm97_vm3 = vcmask 259072   ;;  %v377_v10 = vld [vmem:[%s584_s2] ss:$0 sm:$0xff]  ;;  %vm138_vm4 = vcmask 1045504  }
   0x4   :  { %28 = vst [vmem:[#allocation5] sm:$0x3f] %v410_v7 }
   0x5   :  { %133 = vst.msk [vmem:[#allocation7 + $0x8] sm:$0x3f] %vm97_vm3, %v453_v8  ;;  %vm166_vm15 = vcmp.eq.s32.totalorder %v453_v8, 0  ;;  %vm200_vm1 = vcmp.eq.s32.totalorder %v453_v8, 1 }
   0x6   :  { %387 = vmatpush3.bf16.msra.mxu0 %v400_v2 }
   0x9   :  { %389 = vmatmul.mubr.msk.bf16.vlgmr.msra.gmra.mxu0 %vm53_vm2, %v29_v3  ;;  %v123_v5 = vld [vmem:[#allocation4] sm:$0x3f] }
   0xa   :  { %124 = vst [vmem:[#allocation6] sm:$0x3f] %v123_v5 }
   0xb   :  { %v125_v9 = vld [vmem:[#allocation5] sm:$0x3f] }
   0xc   :  { %126 = vst [vmem:[#allocation7] sm:$0x3f] %v125_v9  ;;  %v468_v22 = vld [vmem:[#allocation7 + $0x8] sm:$0x3f] }
  0x11   :  { %v134_v16 = vld [vmem:[#allocation6] sm:$0x3f] }
  0x12   :  { %v139_v17 = vsel %vm138_vm4, %v134_v16, -inf }
  0x13   :  { %v466_v21 = vld [vmem:[#allocation7] sm:$0x3f] }
  0xc9   :  { %v91_v11 = vpop.f32.mrf.mxu0 }
  0xca   :  { %v460_v12 = vadd.f32 %v377_v10, %v91_v11 }
  0xcb   :  { %v390_v13 = vpop.f32.mrf.mxu0 }
  0xcc   :  { %127 = vst.msk [vmem:[#allocation6 + $0x8] sm:$0x3f] %vm97_vm3, %v460_v12 }
  0xcd   :  { %v94_v14 = vpop.f32.mrf.mxu0 }
  0xcf   :  { %v391_v15 = vpop.f32.mrf.mxu0 }
  0xd3   :  { %v135_v18 = vld [vmem:[#allocation6 + $0x8] sm:$0x3f] }
  0xd4   :  { %v140_v19 = vsel %vm97_vm3, %v135_v18, -inf }
  0xd5   :  { %v141_v20 = vmax.f32 %v139_v17, %v140_v19 }
  0xd7   :  { %142 = vmax.xlane.f32.xlu0 %v141_v20 }
 0x160   :  { %v470_v23 = vpop.xlane.xlu0 %142 }
 0x161   :  { %vm144_vm5 = vcmp.eq.f32.partialorder %v134_v16, %v470_v23  ;;  %vm145_vm6 = vcmp.eq.f32.partialorder %v135_v18, %v470_v23 }
 0x162   :  { %v146_v24 = vsel %vm144_vm5, %v466_v21, 2147483647  ;;  %v147_v25 = vsel %vm145_vm6, %v468_v22, 2147483647 }
 0x163   :  { %v148_v26 = vsel %vm138_vm4, %v146_v24, 2147483647  ;;  %v149_v27 = vsel %vm97_vm3, %v147_v25, 2147483647 }
 0x164   :  { %vm150_vm7 = vcmp.lt.s32.totalorder %v148_v26, %v149_v27 }
 0x165   :  { %v151_v28 = vsel %vm150_vm7, %v148_v26, %v149_v27 }
 0x166   :  { %v153_v29 = vshra.s32 %v151_v28, 16  ;;  %v152_v31 = vand.u32 65535, %v151_v28 }
 0x168   :  { %v155_v30 = vcvt.s32.f32 %v153_v29  ;;  %v154_v33 = vcvt.s32.f32 %v152_v31 }
 0x16a   :  { %156 = vmin.xlane.f32.xlu0 %v155_v30 }
 0x1f3   :  { %v157_v32 = vpop.xlane.xlu0 %156 }
 0x1f4   :  { %vm158_vm8 = vcmp.eq.f32.partialorder %v155_v30, %v157_v32  ;;  %v163_v35 = vcvt.f32.s32 %v157_v32 }
 0x1f5   :  { %v159_v34 = vsel %vm158_vm8, %v154_v33, inf }
 0x1f6   :  { %160 = vmin.xlane.f32.xlu1 %v159_v34  ;;  %v164_v37 = vshll.u32 %v163_v35, 16 }
 0x27f   :  { %v161_v36 = vpop.xlane.xlu1 %160 }
 0x280   :  { %v162_v38 = vcvt.f32.s32 %v161_v36 }
 0x282   :  { %v165_v39 = vadd.s32 %v164_v37, %v162_v38 }
 0x284   :  { %vm169_vm9 = vcmp.eq.s32.totalorder %v466_v21, %v165_v39  ;;  %vm170_vm10 = vcmp.eq.s32.totalorder %v468_v22, %v165_v39  ;;  %v168_v62 = vsel %vm166_vm15, %v165_v39, 4294967295 }
 0x285   :  { %v171_v40 = vsel %vm169_vm9, -1e+30, %v134_v16  ;;  %v172_v41 = vsel %vm170_vm10, -1e+30, %v135_v18  ;;  %vm234_vm10 = vcmp.eq.s32.totalorder %v453_v8, 2 }
 0x286   :  { %v173_v42 = vsel %vm138_vm4, %v171_v40, -inf  ;;  %v174_v43 = vsel %vm97_vm3, %v172_v41, -inf }
 0x287   :  { %v175_v44 = vmax.f32 %v173_v42, %v174_v43 }
 0x289   :  { %176 = vmax.xlane.f32.xlu1 %v175_v44 }
 0x312   :  { %v482_v45 = vpop.xlane.xlu1 %176 }
 0x313   :  { %vm178_vm11 = vcmp.eq.f32.partialorder %v171_v40, %v482_v45  ;;  %vm179_vm12 = vcmp.eq.f32.partialorder %v172_v41, %v482_v45 }
 0x314   :  { %v180_v46 = vsel %vm178_vm11, %v466_v21, 2147483647  ;;  %v181_v47 = vsel %vm179_vm12, %v468_v22, 2147483647 }
 0x315   :  { %v182_v48 = vsel %vm138_vm4, %v180_v46, 2147483647  ;;  %v183_v49 = vsel %vm97_vm3, %v181_v47, 2147483647 }
 0x316   :  { %vm184_vm13 = vcmp.lt.s32.totalorder %v182_v48, %v183_v49 }
 0x317   :  { %v185_v50 = vsel %vm184_vm13, %v182_v48, %v183_v49 }
 0x318   :  { %v187_v51 = vshra.s32 %v185_v50, 16  ;;  %v186_v53 = vand.u32 65535, %v185_v50 }
 0x31a   :  { %v189_v52 = vcvt.s32.f32 %v187_v51  ;;  %v188_v55 = vcvt.s32.f32 %v186_v53 }
 0x31c   :  { %190 = vmin.xlane.f32.xlu0 %v189_v52 }
 0x3a5   :  { %v191_v54 = vpop.xlane.xlu0 %190 }
 0x3a6   :  { %vm192_vm14 = vcmp.eq.f32.partialorder %v189_v52, %v191_v54  ;;  %v197_v57 = vcvt.f32.s32 %v191_v54 }
 0x3a7   :  { %v193_v56 = vsel %vm192_vm14, %v188_v55, inf }
 0x3a8   :  { %194 = vmin.xlane.f32.xlu1 %v193_v56  ;;  %v198_v59 = vshll.u32 %v197_v57, 16  ;;  %v98_v57 = vsel %vm97_vm3, %v460_v12, -inf }
 0x431   :  { %v195_v58 = vpop.xlane.xlu1 %194 }
 0x432   :  { %v196_v60 = vcvt.f32.s32 %v195_v58  ;;  %v411_v58 = vmov 0  }
 0x433   :  { %397 = vset.pattern.permute.xlu0 %v411_v58  ;;  %398 = vset.pattern.permute.xlu1 %v411_v58 }
 0x434   :  { %v199_v61 = vadd.s32 %v198_v59, %v196_v60 }
 0x436   :  { %v202_v63 = vsel %vm200_vm1, %v199_v61, %v168_v62  ;;  %vm203_vm2 = vcmp.eq.s32.totalorder %v466_v21, %v199_v61  ;;  %vm204_vm5 = vcmp.eq.s32.totalorder %v468_v22, %v199_v61  ;;  %v101_v62 = vld [vmem:[#allocation2] sm:$0x3f] }
 0x437   :  { %v205_v0 = vsel %vm203_vm2, -1e+30, %v171_v40  ;;  %v206_v1 = vsel %vm204_vm5, -1e+30, %v172_v41 }
 0x438   :  { %v207_v2 = vsel %vm138_vm4, %v205_v0, -inf  ;;  %v208_v3 = vsel %vm97_vm3, %v206_v1, -inf }
 0x439   :  { %v209_v4 = vmax.f32 %v207_v2, %v208_v3 }
 0x43b   :  { %210 = vmax.xlane.f32.xlu0 %v209_v4 }
 0x4c4   :  { %v500_v5 = vpop.xlane.xlu0 %210 }
 0x4c5   :  { %vm212_vm6 = vcmp.eq.f32.partialorder %v205_v0, %v500_v5  ;;  %vm213_vm7 = vcmp.eq.f32.partialorder %v206_v1, %v500_v5 }
 0x4c6   :  { %v214_v6 = vsel %vm212_vm6, %v466_v21, 2147483647  ;;  %v215_v7 = vsel %vm213_vm7, %v468_v22, 2147483647  ;;  %vm268_vm6 = vcmp.eq.s32.totalorder %v453_v8, 3 }
 0x4c7   :  { %v216_v9 = vsel %vm138_vm4, %v214_v6, 2147483647  ;;  %v217_v10 = vsel %vm97_vm3, %v215_v7, 2147483647 }
 0x4c8   :  { %vm218_vm8 = vcmp.lt.s32.totalorder %v216_v9, %v217_v10 }
 0x4c9   :  { %v219_v11 = vsel %vm218_vm8, %v216_v9, %v217_v10 }
 0x4ca   :  { %v221_v13 = vshra.s32 %v219_v11, 16  ;;  %v220_v15 = vand.u32 65535, %v219_v11 }
 0x4cc   :  { %v223_v14 = vcvt.s32.f32 %v221_v13  ;;  %v222_v17 = vcvt.s32.f32 %v220_v15 }
 0x4ce   :  { %224 = vmin.xlane.f32.xlu1 %v223_v14 }
 0x557   :  { %v225_v16 = vpop.xlane.xlu1 %224 }
 0x558   :  { %vm226_vm9 = vcmp.eq.f32.partialorder %v223_v14, %v225_v16  ;;  %v231_v19 = vcvt.f32.s32 %v225_v16 }
 0x559   :  { %v227_v18 = vsel %vm226_vm9, %v222_v17, inf }
 0x55a   :  { %228 = vmin.xlane.f32.xlu0 %v227_v18  ;;  %v232_v24 = vshll.u32 %v231_v19, 16 }
 0x5e3   :  { %v229_v20 = vpop.xlane.xlu0 %228 }
 0x5e4   :  { %v230_v25 = vcvt.f32.s32 %v229_v20 }
 0x5e6   :  { %v233_v26 = vadd.s32 %v232_v24, %v230_v25 }
 0x5e8   :  { %v236_v27 = vsel %vm234_vm10, %v233_v26, %v202_v63  ;;  %vm237_vm11 = vcmp.eq.s32.totalorder %v466_v21, %v233_v26  ;;  %vm238_vm12 = vcmp.eq.s32.totalorder %v468_v22, %v233_v26 }
 0x5e9   :  { %v239_v28 = vsel %vm237_vm11, -1e+30, %v205_v0  ;;  %v240_v29 = vsel %vm238_vm12, -1e+30, %v206_v1 }
 0x5ea   :  { %v241_v30 = vsel %vm138_vm4, %v239_v28, -inf  ;;  %v242_v31 = vsel %vm97_vm3, %v240_v29, -inf }
 0x5eb   :  { %v243_v32 = vmax.f32 %v241_v30, %v242_v31 }
 0x5ed   :  { %244 = vmax.xlane.f32.xlu1 %v243_v32 }
 0x676   :  { %v515_v33 = vpop.xlane.xlu1 %244 }
 0x677   :  { %vm246_vm13 = vcmp.eq.f32.partialorder %v239_v28, %v515_v33  ;;  %vm247_vm14 = vcmp.eq.f32.partialorder %v240_v29, %v515_v33 }
 0x678   :  { %v248_v34 = vsel %vm246_vm13, %v466_v21, 2147483647  ;;  %v249_v35 = vsel %vm247_vm14, %v468_v22, 2147483647  ;;  %vm302_vm14 = vcmp.eq.s32.totalorder %v453_v8, 4 }
 0x679   :  { %v250_v36 = vsel %vm138_vm4, %v248_v34, 2147483647  ;;  %v251_v37 = vsel %vm97_vm3, %v249_v35, 2147483647  ;;  %v167_v34 = vsel %vm166_vm15, %v470_v23, -1e+30 }
 0x67a   :  { %vm252_vm2 = vcmp.lt.s32.totalorder %v250_v36, %v251_v37  ;;  %v201_v35 = vsel %vm200_vm1, %v482_v45, %v167_v34  ;;  %v103_v23 = vld [vmem:[#allocation3] sm:$0x3f] }
 0x67b   :  { %v253_v38 = vsel %vm252_vm2, %v250_v36, %v251_v37  ;;  %v235_v36 = vsel %vm234_vm10, %v500_v5, %v201_v35 }
 0x67c   :  { %v255_v39 = vshra.s32 %v253_v38, 16  ;;  %v254_v41 = vand.u32 65535, %v253_v38  ;;  %v269_v37 = vsel %vm268_vm6, %v515_v33, %v235_v36 }
 0x67e   :  { %v257_v40 = vcvt.s32.f32 %v255_v39  ;;  %v256_v43 = vcvt.s32.f32 %v254_v41 }
 0x680   :  { %258 = vmin.xlane.f32.xlu0 %v257_v40 }
 0x709   :  { %v259_v42 = vpop.xlane.xlu0 %258 }
 0x70a   :  { %vm260_vm5 = vcmp.eq.f32.partialorder %v257_v40, %v259_v42  ;;  %v265_v46 = vcvt.f32.s32 %v259_v42 }
 0x70b   :  { %v261_v44 = vsel %vm260_vm5, %v256_v43, inf }
 0x70c   :  { %262 = vmin.xlane.f32.xlu1 %v261_v44  ;;  %v266_v48 = vshll.u32 %v265_v46, 16 }
 0x795   :  { %v263_v47 = vpop.xlane.xlu1 %262 }
 0x796   :  { %v264_v49 = vcvt.f32.s32 %v263_v47 }
 0x798   :  { %v267_v50 = vadd.s32 %v266_v48, %v264_v49 }
 0x79a   :  { %v270_v51 = vsel %vm268_vm6, %v267_v50, %v236_v27  ;;  %vm271_vm7 = vcmp.eq.s32.totalorder %v466_v21, %v267_v50  ;;  %vm272_vm8 = vcmp.eq.s32.totalorder %v468_v22, %v267_v50 }
 0x79b   :  { %v273_v52 = vsel %vm271_vm7, -1e+30, %v239_v28  ;;  %v274_v53 = vsel %vm272_vm8, -1e+30, %v240_v29  ;;  %vm336_vm7 = vcmp.eq.s32.totalorder %v453_v8, 5 }
 0x79c   :  { %v275_v54 = vsel %vm138_vm4, %v273_v52, -inf  ;;  %v276_v55 = vsel %vm97_vm3, %v274_v53, -inf }
 0x79d   :  { %v277_v56 = vmax.f32 %v275_v54, %v276_v55 }
 0x79f   :  { %278 = vmax.xlane.f32.xlu0 %v277_v56 }
 0x7a3   :  { %99 = vmax.xlane.f32.xlu0 %v98_v57  ;;  %v358_v57 = vld [vmem:[%s585_s3] sm:$0x3f] }
 0x828   :  { %v279_v59 = vpop.xlane.xlu0 %278 }
 0x829   :  { %vm280_vm9 = vcmp.eq.f32.partialorder %v273_v52, %v279_v59  ;;  %vm281_vm11 = vcmp.eq.f32.partialorder %v274_v53, %v279_v59  ;;  %v303_v39 = vsel %vm302_vm14, %v279_v59, %v269_v37 }
 0x82a   :  { %v282_v60 = vsel %vm280_vm9, %v466_v21, 2147483647  ;;  %v283_v61 = vsel %vm281_vm11, %v468_v22, 2147483647 }
 0x82b   :  { %v284_v63 = vsel %vm138_vm4, %v282_v60, 2147483647  ;;  %v285_v0 = vsel %vm97_vm3, %v283_v61, 2147483647 }
 0x82c   :  { %v100_v1 = vpop.xlane.xlu0 %99  ;;  %vm286_vm12 = vcmp.lt.s32.totalorder %v284_v63, %v285_v0 }
 0x82d   :  { %v102_v2 = vmax.f32 %v101_v62, %v100_v1  ;;  %v287_v3 = vsel %vm286_vm12, %v284_v63, %v285_v0 }
 0x82e   :  { %v289_v4 = vshra.s32 %v287_v3, 16  ;;  %v288_v9 = vand.u32 65535, %v287_v3 }
 0x82f   :  { %v104_v6 = vsub.f32 %v101_v62, %v102_v2  ;;  %122 = vst.msk [vmem:[#allocation2] sm:$0x3f] %vm24_vm0, %v102_v2  ;;  %110 = vperm.xlu0 %397, %v102_v2  }
 0x830   :  { %v291_v7 = vcvt.s32.f32 %v289_v4  ;;  %v290_v11 = vcvt.s32.f32 %v288_v9 }
 0x831   :  { %v105_v32 = vmul.f32 1.442695, %v104_v6 }
 0x832   :  { %292 = vmin.xlane.f32.xlu1 %v291_v7 }
 0x8aa   :  { %v111_v14 = vpop.permute.xlu0 %110 }
 0x8ab   :  { %v113_v15 = vsub.f32 %v460_v12, %v111_v14 }
 0x8ad   :  { %v114_v16 = vmul.f32 1.442695, %v113_v15 }
 0x8af   :  { %401 = vpow2.f32 %v114_v16 }
 0x8b0   :  { %403 = vpow2.f32 %v105_v32 }
 0x8bb   :  { %v293_v10 = vpop.xlane.xlu1 %292 }
 0x8bc   :  { %vm294_vm13 = vcmp.eq.f32.partialorder %v291_v7, %v293_v10  ;;  %v299_v17 = vcvt.f32.s32 %v293_v10  ;;  %v402_v30 = vpop.eup %401 }
 0x8bd   :  { %v295_v13 = vsel %vm294_vm13, %v290_v11, inf  ;;  %v116_v31 = vsel %vm97_vm3, %v402_v30, 0.0  ;;  %v404_v38 = vpop.eup %403 }
 0x8be   :  { %296 = vmin.xlane.f32.xlu1 %v295_v13  ;;  %v300_v19 = vshll.u32 %v299_v17, 16  ;;  %v107_v42 = vmul.f32 %v404_v38, %v103_v23 }
 0x947   :  { %v297_v18 = vpop.xlane.xlu1 %296 }
 0x948   :  { %v298_v20 = vcvt.f32.s32 %v297_v18 }
 0x94a   :  { %v301_v24 = vadd.s32 %v300_v19, %v298_v20 }
 0x94c   :  { %v541_v25 = vsel %vm302_vm14, %v301_v24, %v270_v51  ;;  %vm305_vm2 = vcmp.eq.s32.totalorder %v466_v21, %v301_v24  ;;  %vm306_vm5 = vcmp.eq.s32.totalorder %v468_v22, %v301_v24 }
 0x94d   :  { %v307_v26 = vsel %vm305_vm2, -1e+30, %v273_v52  ;;  %v308_v27 = vsel %vm306_vm5, -1e+30, %v274_v53 }
 0x94e   :  { %v309_v12 = vsel %vm138_vm4, %v307_v26, -inf  ;;  %v310_v28 = vsel %vm97_vm3, %v308_v27, -inf }
 0x94f   :  { %v311_v29 = vmax.f32 %v309_v12, %v310_v28 }
 0x951   :  { %312 = vmax.xlane.f32.xlu1 %v311_v29 }
 0x955   :  { %117 = vadd.xlane.f32.xlu1 %v116_v31 }
 0x9da   :  { %v313_v40 = vpop.xlane.xlu1 %312 }
 0x9db   :  { %vm314_vm15 = vcmp.eq.f32.partialorder %v307_v26, %v313_v40  ;;  %vm315_vm8 = vcmp.eq.f32.partialorder %v308_v27, %v313_v40  ;;  %v337_v45 = vsel %vm336_vm7, %v313_v40, %v303_v39 }
 0x9dc   :  { %v316_v41 = vsel %vm314_vm15, %v466_v21, 2147483647  ;;  %v317_v5 = vsel %vm315_vm8, %v468_v22, 2147483647  ;;  %339 = vst [vmem:[#allocation4] sm:$0x3f] %v337_v45 }
 0x9dd   :  { %v318_v43 = vsel %vm138_vm4, %v316_v41, 2147483647  ;;  %v319_v33 = vsel %vm97_vm3, %v317_v5, 2147483647  ;;  %v344_v22 = vld [vmem:[#allocation2] sm:$0x3f] }
 0x9de   :  { %v118_v44 = vpop.xlane.xlu1 %117  ;;  %vm320_vm1 = vcmp.lt.s32.totalorder %v318_v43, %v319_v33 }
 0x9df   :  { %v119_v46 = vadd.f32 %v118_v44, %v107_v42  ;;  %v321_v47 = vsel %vm320_vm1, %v318_v43, %v319_v33 }
 0x9e0   :  { %v323_v48 = vshra.s32 %v321_v47, 16  ;;  %v322_v53 = vand.u32 65535, %v321_v47 }
 0x9e1   :  { %121 = vst.msk [vmem:[#allocation3] sm:$0x3f] %vm24_vm0, %v119_v46 }
 0x9e2   :  { %v325_v49 = vcvt.s32.f32 %v323_v48  ;;  %v324_v55 = vcvt.s32.f32 %v322_v53 }
 0x9e3   :  { %v351_v1 = vld [vmem:[#allocation4] sm:$0x3f] }
 0x9e4   :  { %326 = vmin.xlane.f32.xlu1 %v325_v49 }
 0x9e8   :  { %v345_v50 = vld [vmem:[#allocation3] sm:$0x3f] }
 0x9e9   :  { %405 = vlog2.f32 %v345_v50 }
 0x9f6   :  { %v406_v21 = vpop.eup %405 }
 0x9f7   :  { %v347_v51 = vmul.f32 0.6931472, %v406_v21 }
 0x9f9   :  { %v348_v52 = vadd.f32 %v347_v51, %v344_v22 }
 0x9fb   :  { %354 = vperm.xlu1 %398, %v348_v52  }
 0xa6d   :  { %v327_v54 = vpop.xlane.xlu1 %326 }
 0xa6e   :  { %vm328_vm3 = vcmp.eq.f32.partialorder %v325_v49, %v327_v54  ;;  %v333_v59 = vcvt.f32.s32 %v327_v54 }
 0xa6f   :  { %v329_v56 = vsel %vm328_vm3, %v324_v55, inf }
 0xa70   :  { %330 = vmin.xlane.f32.xlu1 %v329_v56  ;;  %v334_v61 = vshll.u32 %v333_v59, 16 }
 0xa76   :  { %v355_v58 = vpop.permute.xlu1 %354 }
 0xa77   :  { %v357_v3 = vsub.f32 %v351_v1, %v355_v58 }
 0xa81   :  { %361 = vperm.xlu1 %398, %v358_v57  }
 0xaf9   :  { %v331_v60 = vpop.xlane.xlu1 %330 }
 0xafa   :  { %v332_v62 = vcvt.f32.s32 %v331_v60 }
 0xafc   :  { %v335_v63 = vadd.s32 %v334_v61, %v332_v62 }
 0xafd   :  { %v362_v2 = vpop.permute.xlu1 %361 }
 0xafe   :  { %v338_v0 = vsel %vm336_vm7, %v335_v63, %v541_v25  ;;  %v364_v7 = vadd.f32 %v362_v2, %v357_v3 }
 0xaff   :  { %340 = vst [vmem:[#allocation5] sm:$0x3f] %v338_v0 }
 0xb06   :  { %v367_v4 = vld [vmem:[#allocation5] sm:$0x3f] }
 0xb07   :  { %v349_v6 = vld [vmem:[#allocation5] sm:$0x3f]  ;;  %368 = vst [vmem:[%s586_s5] sm:$0x3f] %v367_v4 }
 0xb08   :  { %vm350_vm0 = vcmp.ge.s32.totalorder %v349_v6, 0 }
 0xb09   :  { %v365_v9 = vsel %vm350_vm0, %v364_v7, -1e+30 }
 0xb0a   :  { %366 = vst [vmem:[%s587_s4] sm:$0x3f] %v365_v9 }

</bundles_post_ra>
